<compile_context>
chip_gen: v6e
topology: v6e:2x2x1
jax: 0.10.0
libtpu: 0.0.40
codegen_flags: <defaults>
</compile_context>

<pallas_src>
from functools import partial

import jax
import jax.numpy as jnp
from jax.experimental import pallas as pl
from jax.experimental.pallas import tpu as pltpu


def _lora_conv1d_kernel(x_ref, w_ref, b_ref, o_ref, col_ref, *,
                        K, P, B_blk, L, L_out, L_out_p, C_in):
    """One grid step: B_blk batch rows -> one im2col contraction.

    x_ref:   (B_blk, C_in, L)          raw (un-padded) input rows
    w_ref:   (C_out, K*C_in)           merged weight: conv_w + scaling*B@A
    b_ref:   (C_out, 1)                conv bias, kept in f32
    o_ref:   (B_blk, C_out, L_out_p)   L_out_p is a multiple of 128
    col_ref: (K*C_in, B_blk*L_out_p)   VMEM im2col scratch (compute dtype)
    """
    cdt = col_ref.dtype

    # ---- Build the im2col scratch with direct slice stores (no concatenate).
    # The b/k loops are static Python loops, but each iteration only moves one
    # tile ref->ref, so no large values stay live across iterations.
    for b in range(B_blk):
        base = b * L_out_p
        for k in range(K):
            r0, r1 = k * C_in, (k + 1) * C_in
            # Output column t reads input column t + k - P.
            t0 = max(0, P - k)
            t1 = max(t0, min(L_out, L + P - k))
            if t0 > 0:                               # left conv-padding halo
                col_ref[r0:r1, base:base + t0] = jnp.zeros((C_in, t0), cdt)
            if t1 < L_out_p:                         # right halo + lane pad
                col_ref[r0:r1, base + t1:base + L_out_p] = jnp.zeros(
                    (C_in, L_out_p - t1), cdt)
            if t1 > t0:                              # valid data window
                col_ref[r0:r1, base + t0:base + t1] = (
                    x_ref[b, :, t0 + k - P:t1 + k - P].astype(cdt))

    # ---- Single MXU contraction (depth K*C_in) for all B_blk rows at once.
    res = jnp.dot(w_ref[...], col_ref[...],
                  preferred_element_type=jnp.float32)  # (C_out, B_blk*L_out_p)

    # ---- Epilogue: f32 bias add, cast, lane-aligned (128-multiple) stores.
    bias = b_ref[...]                                  # (C_out, 1) f32
    for b in range(B_blk):
        o_ref[b] = (res[:, b * L_out_p:(b + 1) * L_out_p] + bias
                    ).astype(o_ref.dtype)


def lora_conv1d(x, conv_w, conv_b, lora_A, lora_B, *,
                stride=1, padding=0, dilation=1, lora_alpha=32,
                batch_block=8, compute_dtype=None):
    """Pallas implementation of LoRAConv1D.forward (eval mode).

    x:      (N, C_in, L)         NCL layout, same as nn.Conv1d
    conv_w: (C_out, C_in, K)     conv_b: (C_out,)
    lora_A: (rank, C_in, K)      lora_B: (C_out, rank, 1)
    compute_dtype: optional MXU input dtype (e.g. jnp.bfloat16); accumulation
                   and the bias add stay f32, output keeps x.dtype.
    """
    assert stride == 1 and dilation == 1, "kernel supports stride=1, dilation=1"
    N, C_in, L = x.shape
    C_out, _, K = conv_w.shape
    rank = lora_A.shape[0]
    scaling = float(lora_alpha) / float(rank)
    out_dtype = x.dtype
    if compute_dtype is None:
        compute_dtype = x.dtype

    L_out = L + 2 * padding - K + 1
    assert L_out > 0, "sequence too short for this kernel size / padding"
    L_out_p = ((L_out + 127) // 128) * 128            # lane-dense output

    # ---- Eval-mode LoRA merge (exact: dropout is identity in eval mode).
    # Contraction-axis row ordering is k-major / c-minor to match the im2col
    # stacking in the kernel.
    w2d = jnp.transpose(conv_w, (0, 2, 1)).reshape(C_out, K * C_in)
    a2d = jnp.transpose(lora_A, (0, 2, 1)).reshape(rank, K * C_in)
    b2d = lora_B.reshape(C_out, rank)
    w_eff = (w2d.astype(jnp.float32)
             + scaling * jnp.dot(b2d.astype(jnp.float32),
                                 a2d.astype(jnp.float32))
             ).astype(compute_dtype)                  # (C_out, K*C_in)
    bias = conv_b.reshape(C_out, 1).astype(jnp.float32)

    # ---- Batch blocking: B_blk divides N (no dead tail rows), grid has >=2
    # steps when N >= 2 (v7x has 2 TensorCores), per-step VMEM under budget.
    c_bytes = jnp.dtype(compute_dtype).itemsize
    bytes_per_row = (C_in * L * x.dtype.itemsize * 2                 # in, dbl-buf
                     + C_out * L_out_p * jnp.dtype(out_dtype).itemsize * 2
                     + K * C_in * L_out_p * c_bytes                  # im2col
                     + C_out * L_out_p * 4)                          # f32 result
    vmem_budget = 36 * 1024 * 1024
    cap = max(1, min(batch_block,
                     N // 2 if N >= 2 else 1,
                     vmem_budget // bytes_per_row))
    B_blk = 1
    for d in range(int(cap), 0, -1):
        if N % d == 0:
            B_blk = d
            break

    kernel = partial(_lora_conv1d_kernel, K=K, P=padding, B_blk=B_blk,
                     L=L, L_out=L_out, L_out_p=L_out_p, C_in=C_in)

    out_p = pl.pallas_call(
        kernel,
        out_shape=jax.ShapeDtypeStruct((N, C_out, L_out_p), out_dtype),
        grid=(N // B_blk,),
        in_specs=[
            pl.BlockSpec((B_blk, C_in, L), lambda n: (n, 0, 0)),
            pl.BlockSpec((C_out, K * C_in), lambda n: (0, 0)),
            pl.BlockSpec((C_out, 1), lambda n: (0, 0)),
        ],
        out_specs=pl.BlockSpec((B_blk, C_out, L_out_p), lambda n: (n, 0, 0)),
        scratch_shapes=[pltpu.VMEM((K * C_in, B_blk * L_out_p), compute_dtype)],
        compiler_params=pltpu.CompilerParams(
            dimension_semantics=("parallel",),
            vmem_limit_bytes=48 * 1024 * 1024),
    )(x, w_eff, bias)

    return out_p[:, :, :L_out]


def _reference(x, conv_w, conv_b, lora_A, lora_B, *, padding, lora_alpha):
    """Pure-JAX reference of the PyTorch forward (eval mode)."""
    rank = lora_A.shape[0]
    scaling = float(lora_alpha) / float(rank)
    dn_main = jax.lax.conv_dimension_numbers(x.shape, conv_w.shape,
                                             ('NCH', 'OIH', 'NCH'))
    conv = jax.lax.conv_general_dilated(
        x, conv_w, (1,), [(padding, padding)], dimension_numbers=dn_main)
    conv = conv + conv_b[None, :, None]

    dn_a = jax.lax.conv_dimension_numbers(x.shape, lora_A.shape,
                                          ('NCH', 'OIH', 'NCH'))
    z = jax.lax.conv_general_dilated(
        x, lora_A, (1,), [(padding, padding)], dimension_numbers=dn_a)
    dn_b = jax.lax.conv_dimension_numbers(z.shape, lora_B.shape,
                                          ('NCH', 'OIH', 'NCH'))
    lo = jax.lax.conv_general_dilated(
        z, lora_B, (1,), [(0, 0)], dimension_numbers=dn_b)
    return conv + lo * scaling


if __name__ == "__main__":
    # Small shapes consistent with the module: batch=2, in_channels=4,
    # out_channels=8, kernel_size=3, length=16, rank=4, padding=1.
    N, C_in, C_out, K, L, rank = 2, 4, 8, 3, 16, 4
    padding = 1
    lora_alpha = 32

    key = jax.random.PRNGKey(0)
    kx, kw, kb, ka, kbl = jax.random.split(key, 5)

    x = jax.random.normal(kx, (N, C_in, L), dtype=jnp.float32)
    conv_w = jax.random.normal(kw, (C_out, C_in, K), dtype=jnp.float32) * 0.1
    conv_b = jax.random.normal(kb, (C_out,), dtype=jnp.float32) * 0.1
    # Module init: lora_A ~ N(0, 0.02), lora_B = zeros.  Use a small random
    # lora_B instead (deterministic) so the LoRA path is actually exercised.
    lora_A = jax.random.normal(ka, (rank, C_in, K), dtype=jnp.float32) * 0.02
    lora_B = jax.random.normal(kbl, (C_out, rank, 1), dtype=jnp.float32) * 0.02

    ref = _reference(x, conv_w, conv_b, lora_A, lora_B,
                     padding=padding, lora_alpha=lora_alpha)
    ref = jax.block_until_ready(ref)

    # f32 path (tight check).
    out = lora_conv1d(x, conv_w, conv_b, lora_A, lora_B,
                      padding=padding, lora_alpha=lora_alpha)
    out = jax.block_until_ready(out)
    assert out.shape == ref.shape, (out.shape, ref.shape)
    assert jnp.allclose(out, ref, atol=1e-4, rtol=1e-4), \
        float(jnp.max(jnp.abs(out - ref)))

    # bf16-MXU path (f32 accumulation, f32 bias) — loose check.
    out_bf16 = lora_conv1d(x, conv_w, conv_b, lora_A, lora_B,
                           padding=padding, lora_alpha=lora_alpha,
                           compute_dtype=jnp.bfloat16)
    out_bf16 = jax.block_until_ready(out_bf16)
    assert jnp.allclose(out_bf16, ref, atol=3e-2, rtol=3e-2), \
        float(jnp.max(jnp.abs(out_bf16 - ref)))

    print("KERNEL_OK")
</pallas_src>

<mosaic_0001>
module attributes {stable_mosaic.version = 11 : i64} {
  func.func @_lora_conv1d_kernel(%arg0: i32, %arg1: memref<1x4x16xf32, #tpu.memory_space<vmem>>, %arg2: memref<8x12xf32, #tpu.memory_space<vmem>>, %arg3: memref<8x1xf32, #tpu.memory_space<vmem>>, %arg4: memref<1x8x128xf32, #tpu.memory_space<vmem>>, %arg5: memref<12x128xf32, #tpu.memory_space<vmem>>) attributes {dimension_semantics = [#tpu.dimension_semantics<parallel>], iteration_bounds = array<i64: 2>, scalar_prefetch = 0 : i64, scratch_operands = 1 : i64, tpu.core_type = #tpu.core_type<tc>, window_params = [{transform_indices = @transform_0, window_bounds = array<i64: 1, 4, 16>}, {pipeline_mode = #tpu.pipeline_mode<synchronous>, transform_indices = @transform_1, window_bounds = array<i64: 8, 12>}, {pipeline_mode = #tpu.pipeline_mode<synchronous>, transform_indices = @transform_2, window_bounds = array<i64: 8, 1>}, {transform_indices = @transform_3, window_bounds = array<i64: 1, 8, 128>}]} {
    %cst = arith.constant 0.000000e+00 : f32
    %0 = vector.broadcast %cst : f32 to vector<4x1xf32>
    %c0 = arith.constant 0 : index
    %c0_0 = arith.constant 0 : index
    %1 = vector.load %arg5[%c0, %c0_0] : memref<12x128xf32, #tpu.memory_space<vmem>>, vector<4x1xf32>
    tpu.vector_store %arg5[%c0, %c0_0], %0 {strides = array<i32>} : memref<12x128xf32, #tpu.memory_space<vmem>>, vector<4x1xf32>,
    %cst_1 = arith.constant 0.000000e+00 : f32
    %2 = vector.broadcast %cst_1 : f32 to vector<4x112xf32>
    %c0_2 = arith.constant 0 : index
    %c16 = arith.constant 16 : index
    %3 = vector.load %arg5[%c0_2, %c16] : memref<12x128xf32, #tpu.memory_space<vmem>>, vector<4x112xf32>
    tpu.vector_store %arg5[%c0_2, %c16], %2 {strides = array<i32>} : memref<12x128xf32, #tpu.memory_space<vmem>>, vector<4x112xf32>,
    %c0_3 = arith.constant 0 : index
    %c0_4 = arith.constant 0 : index
    %c0_5 = arith.constant 0 : index
    %4 = vector.load %arg1[%c0_3, %c0_4, %c0_5] : memref<1x4x16xf32, #tpu.memory_space<vmem>>, vector<1x4x15xf32>
    %5 = vector.shape_cast %4 : vector<1x4x15xf32> to vector<4x15xf32>
    %c0_6 = arith.constant 0 : index
    %c1 = arith.constant 1 : index
    %6 = vector.load %arg5[%c0_6, %c1] : memref<12x128xf32, #tpu.memory_space<vmem>>, vector<4x15xf32>
    tpu.vector_store %arg5[%c0_6, %c1], %5 {strides = array<i32>} : memref<12x128xf32, #tpu.memory_space<vmem>>, vector<4x15xf32>,
    %cst_7 = arith.constant 0.000000e+00 : f32
    %7 = vector.broadcast %cst_7 : f32 to vector<4x112xf32>
    %c4 = arith.constant 4 : index
    %c16_8 = arith.constant 16 : index
    %8 = vector.load %arg5[%c4, %c16_8] : memref<12x128xf32, #tpu.memory_space<vmem>>, vector<4x112xf32>
    tpu.vector_store %arg5[%c4, %c16_8], %7 {strides = array<i32>} : memref<12x128xf32, #tpu.memory_space<vmem>>, vector<4x112xf32>,
    %c0_9 = arith.constant 0 : index
    %c0_10 = arith.constant 0 : index
    %c0_11 = arith.constant 0 : index
    %9 = vector.load %arg1[%c0_9, %c0_10, %c0_11] : memref<1x4x16xf32, #tpu.memory_space<vmem>>, vector<1x4x16xf32>
    %10 = vector.shape_cast %9 : vector<1x4x16xf32> to vector<4x16xf32>
    %c4_12 = arith.constant 4 : index
    %c0_13 = arith.constant 0 : index
    %11 = vector.load %arg5[%c4_12, %c0_13] : memref<12x128xf32, #tpu.memory_space<vmem>>, vector<4x16xf32>
    tpu.vector_store %arg5[%c4_12, %c0_13], %10 {strides = array<i32>} : memref<12x128xf32, #tpu.memory_space<vmem>>, vector<4x16xf32>,
    %cst_14 = arith.constant 0.000000e+00 : f32
    %12 = vector.broadcast %cst_14 : f32 to vector<4x113xf32>
    %c8 = arith.constant 8 : index
    %c15 = arith.constant 15 : index
    %13 = vector.load %arg5[%c8, %c15] : memref<12x128xf32, #tpu.memory_space<vmem>>, vector<4x113xf32>
    tpu.vector_store %arg5[%c8, %c15], %12 {strides = array<i32>} : memref<12x128xf32, #tpu.memory_space<vmem>>, vector<4x113xf32>,
    %c0_15 = arith.constant 0 : index
    %c0_16 = arith.constant 0 : index
    %c1_17 = arith.constant 1 : index
    %14 = vector.load %arg1[%c0_15, %c0_16, %c1_17] : memref<1x4x16xf32, #tpu.memory_space<vmem>>, vector<1x4x15xf32>
    %15 = vector.shape_cast %14 : vector<1x4x15xf32> to vector<4x15xf32>
    %c8_18 = arith.constant 8 : index
    %c0_19 = arith.constant 0 : index
    %16 = vector.load %arg5[%c8_18, %c0_19] : memref<12x128xf32, #tpu.memory_space<vmem>>, vector<4x15xf32>
    tpu.vector_store %arg5[%c8_18, %c0_19], %15 {strides = array<i32>} : memref<12x128xf32, #tpu.memory_space<vmem>>, vector<4x15xf32>,
    %c0_20 = arith.constant 0 : index
    %c0_21 = arith.constant 0 : index
    %17 = vector.load %arg2[%c0_20, %c0_21] : memref<8x12xf32, #tpu.memory_space<vmem>>, vector<8x12xf32>
    %c0_22 = arith.constant 0 : index
    %c0_23 = arith.constant 0 : index
    %18 = vector.load %arg5[%c0_22, %c0_23] : memref<12x128xf32, #tpu.memory_space<vmem>>, vector<12x128xf32>
    %cst_24 = arith.constant dense<0.000000e+00> : vector<8x128xf32>
    %19 = tpu.matmul %17, %18, %cst_24 {dimension_numbers = #tpu.dot_dimension_numbers<[1], [0], [0], [1], [0, 0, 1, 1], [], []>} : vector<8x12xf32>, vector<12x128xf32>, vector<8x128xf32> -> vector<8x128xf32>
    %c0_25 = arith.constant 0 : index
    %c0_26 = arith.constant 0 : index
    %20 = vector.load %arg3[%c0_25, %c0_26] : memref<8x1xf32, #tpu.memory_space<vmem>>, vector<8x1xf32>
    %21 = vector.broadcast %20 : vector<8x1xf32> to vector<8x128xf32>
    %22 = arith.addf %19, %21 : vector<8x128xf32>
    %c0_27 = arith.constant 0 : index
    %c0_28 = arith.constant 0 : index
    %c0_29 = arith.constant 0 : index
    %23 = vector.load %arg4[%c0_27, %c0_28, %c0_29] : memref<1x8x128xf32, #tpu.memory_space<vmem>>, vector<1x8x128xf32>
    %24 = vector.shape_cast %23 : vector<1x8x128xf32> to vector<8x128xf32>
    %25 = vector.shape_cast %22 : vector<8x128xf32> to vector<1x8x128xf32>
    tpu.vector_store %arg4[%c0_27, %c0_28, %c0_29], %25 {strides = array<i32>} : memref<1x8x128xf32, #tpu.memory_space<vmem>>, vector<1x8x128xf32>,
    return
  }
  func.func @transform_0(%arg0: i32) -> (i32, i32, i32) {
    %c0_i32 = arith.constant 0 : i32
    %c0_i32_0 = arith.constant 0 : i32
    %c0_i32_1 = arith.constant 0 : i32
    return %arg0, %c0_i32, %c0_i32_0 : i32, i32, i32
  }
  func.func @transform_1(%arg0: i32) -> (i32, i32) {
    %c0_i32 = arith.constant 0 : i32
    %c0_i32_0 = arith.constant 0 : i32
    %c0_i32_1 = arith.constant 0 : i32
    return %c0_i32, %c0_i32_0 : i32, i32
  }
  func.func @transform_2(%arg0: i32) -> (i32, i32) {
    %c0_i32 = arith.constant 0 : i32
    %c0_i32_0 = arith.constant 0 : i32
    %c0_i32_1 = arith.constant 0 : i32
    return %c0_i32, %c0_i32_0 : i32, i32
  }
  func.func @transform_3(%arg0: i32) -> (i32, i32, i32) {
    %c0_i32 = arith.constant 0 : i32
    %c0_i32_0 = arith.constant 0 : i32
    %c0_i32_1 = arith.constant 0 : i32
    return %arg0, %c0_i32, %c0_i32_0 : i32, i32, i32
  }
}

</mosaic_0001>

<bundles_post_ra>
// kernel: tpu_custom_call.1
= control target key start
LH: loop header
LB: loop body
LE: loop exit
PB: predicated region body
PF: predicated region fallthrough
CT: control target
= control target key end

     0   :  { %8 = vsyncpa [#allocation4], 0  ;;  %s690_s0 = inlined_call_operand.vmem [shape: f32[2,4,16], index: 0, kind: input, shape index: {}]   ;;  %s691_s1 = inlined_call_operand.hbm [shape: f32[8,12], index: 1, kind: input, shape index: {}]   ;;  %s692_s2 = inlined_call_operand.vmem [shape: f32[8,1], index: 2, kind: input, shape index: {}]   ;;  %s693_s3 = inlined_call_operand.hbm [shape: f32[2,8,128], index: 3, kind: output, shape index: {}]  }
   0x1   :  { %9 = vsyncpa [#allocation5], 0 }
   0x2   :  { %11 = vsyncpa [#allocation5 + $0x1], 0  ;;  %s576_s12 = smov 0   ;;  %s578_s13 = smov 0  }
   0x3   :  { %s580_s14 = smov 0   ;;  %s582_s15 = smov 0  }
   0x4 LB: > { %s597_s16 = sadd.s32 4294967295, %s547_s15   ;;  %s376_s17 = sadd.s32 4294967294, %s547_s15   ;;  %s547_s15 = sphi %s582_s15, %s701_s15   ;;  %s543_s14 = sphi %s580_s14, %s700_s14   ;;  %s539_s13 = sphi %s578_s13, %s699_s13   ;;  %s535_s12 = sphi %s576_s12, %s698_s12  }
   0x5   : > { %s601_s18 = sadd.s32 1, %s547_s15   ;;  %s92_s19 = sadd.s32 1, %s543_s14 }
   0x6   : > { %s89_s20 = ssub.s32 %s547_s15, %s601_s18  ;;  %p102_p0 = scmp.ne.s32.totalorder %s543_s14, %s539_s13 }
   0x7   : > { %p90_p1 = scmp.eq.s32.totalorder %s89_s20, 0  ;;  %p103_p2 = scmp.eq.s32.totalorder %s597_s16, 1 }
   0x8   : > { %p108_p3 = scmp.ne.s32.totalorder %s539_s13, %s535_s12  ;;  %p109_p4 = scmp.eq.s32.totalorder %s376_s17, 1 }
   0x9   : > { %s612_s21 = scalar_select %p90_p1, %s543_s14, %s92_s19  }
   0xa   : > { %p614_p5 = por %p103_p2, %p102_p0  ;;  %p618_p6 = por %p109_p4, %p108_p3 }
   0xb   : > { %p377_p7 = scmp.ge.s32.totalorder %s547_s15, 1  ;;  %p116_p8 = scmp.lt.s32.totalorder %s547_s15, 3 }
   0xc   : > { %s695_s23 = scalar_select %p618_p6, 1, 0 }
   0xd   : > { %p414_p9 = scmp.eq.s32.totalorder %s597_s16, 0  ;;  %p625_p10 = pnand %p377_p7, %p116_p8 }
   0xe   : > { %s549_s25 = smov [#allocation3]  }
   0xf   : > { %s129_s26 = sshll.u32 %s549_s25, 4  ;;  %p406_p11 = pneg %p625_p10  ;;  %s130_s26 = int_to_ptr.vmem [resolvable:$true] %s129_s26 }
  0x10   : > { %s468_s27 = scalar_lea.vmem %s130_s26, 128  ;;  %p476_p3 = scmp.lt.s32.totalorder %s130_s26, %s130_s26 }
  0x11   : > { %p407_p12 = pnand %p414_p9, %p406_p11  ;;  %p469_p0 = scmp.ne.s32.totalorder %s130_s26, %s468_s27 }
  0x12   : > { %p477_p4 = scmp.lt.s32.totalorder %s468_s27, %s468_s27 }
  0x13   : > { %p459_p13 = pneg %p407_p12 }
  0x14   : > { %p478_p6 = por %p477_p4, %p476_p3 }
  0x15   : > { %p471_p1 = pnand %p469_p0, %p459_p13 }
  0x17   : > { %p472_p2 = pneg %p471_p1 }
  0x19   : > { %p479_p7 = pnand %p478_p6, %p472_p2 }
  0x1b   : > { %482 = shalt.err (!%p479_p7)
}
  0x1c   : > { %409 = dma.hbm_to_vmem [thread:$0]  (!%p407_p12), %s691_s1, 128, %s130_s26, [#allocation4]  }
  0x1d   : > { %152 = sbr.rel (%p625_p10) target bundleno = 378 (0x17a), region = 32 }
  0x22   : > { %526 = dma.done.wait (%p414_p9), [#allocation4], 128  }
  0x23   : > { %528 = vsyncadd (%p414_p9), [#allocation4], 4294967168  ;;  %p175_p8 = scmp.lt.s32.totalorder %s597_s16, 1  ;;  %vm181_vm0 = vcmask 1043584   ;;  %v550_v0 = vmov 0.0   ;;  %vm194_vm1 = vcmask 1043576  }
  0x24   : > { %190 = vst.msk [vmem:[#allocation2 + $0x4] sm:$0xf] %vm181_vm0, %v550_v0  ;;  %vm179_vm2 = vcmask 3072   ;;  %393 = vmatprep.subr.mxu0 %v550_v0  ;;  %vm192_vm3 = vcmask 125952   ;;  %vm551_vm4 = vmmov 0   ;;  %s552_s8 = smov 127  }
  0x25   : > { %s176_s30 = scalar_select %p175_p8, %s597_s16, 1  ;;  %195 = vst.msk [vmem:[#allocation2 + $0x8] sm:$0xf] %vm194_vm1, %v550_v0  ;;  %397 = vmatprep.mubr.msk.f32.mxu0 %vm551_vm4, %v550_v0  ;;  %v206_v3 = vld [vmem:[%s692_s2] sm:$0xff]  ;;  %v553_v5 = vmov 0   ;;  %vm201_vm5 = vcmask 117760  }
  0x26   : > { %180 = vst.msk [vmem:[#allocation2] sm:$0xf] %vm179_vm2, %v550_v0  ;;  %455 = vset.pattern.permute.xlu1 %v553_v5  ;;  %456 = vset.pattern.permute.xlu0 %v553_v5  ;;  %s554_s11 = smov 1   ;;  %vm188_vm6 = vcmask 125960   ;;  %vm216_vm7 = vcmask 1043456   ;;  %v203_v9 = vld [vmem:[#allocation3] sm:$0xff] }
  0x27   : > { %182 = vst.msk [vmem:[#allocation2] sm:$0xf] %vm181_vm0, %v550_v0  ;;  %s383_s4 = sshll.u32 %s176_s30, 2  ;;  %209 = vperm.xlu1 %455, %v206_v3   ;;  %vm212_vm8 = vcmask 97280   ;;  %s172_s17 = sand.u32 1, %s539_s13  }
  0x28   : > { %s178_s7 = scalar_lea.vmem %s690_s0, %s383_s4  ;;  %s382_s19 = sshll.u32 %s172_s17, 3 }
  0x29   : > { %v196_v1 = vld [vmem:[%s178_s7] sm:$0xf]  ;;  %s387_s20 = sshll.u32 %s597_s16, 7  ;;  %s174_s24 = scalar_lea.vmem [#allocation6], %s382_s19 }
  0x2a   : > { %v191_v2 = vld [vmem:[%s178_s7] sm:$0xf]  ;;  %198 = vrot.lane.b32.xlu0 %v196_v1, %s552_s8  ;;  %s305_s25 = sshll.u32 %s174_s24, 4  ;;  %s655_s28 = scalar_lea.hbm %s693_s3, %s387_s20  ;;  %s306_s25 = int_to_ptr.vmem [resolvable:$true] %s305_s25 }
  0x2b   : > { %193 = vst.msk [vmem:[#allocation2 + $0x4] sm:$0xf] %vm192_vm3, %v191_v2  ;;  %v183_v4 = vld [vmem:[%s178_s7] sm:$0xf]  ;;  %s292_s29 = scalar_lea.sflag [#allocation5], %s172_s17  ;;  %s483_s30 = scalar_lea.vmem %s306_s25, 128 }
  0x2c   : > { %p484_p6 = scmp.ne.s32.totalorder %s306_s25, %s483_s30  ;;  %s555_s4 = smov [#allocation6]  }
  0x2d   : > { %s487_s16 = sshll.u32 %s555_s4, 4  ;;  %s488_s16 = int_to_ptr.vmem [resolvable:$false] %s487_s16 }
  0x2e   : > { %185 = vrot.lane.b32.xlu0 %v183_v4, %s554_s11  ;;  %p485_p9 = pnand %p484_p6, %p614_p5  ;;  %s489_s5 = scalar_lea.vmem %s488_s16, 256 }
  0x2f   : > { %p490_p11 = scmp.lt.s32.totalorder %s306_s25, %s488_s16  ;;  %p491_p12 = scmp.lt.s32.totalorder %s489_s5, %s483_s30 }
  0x30   : > { %p486_p10 = pneg %p485_p9 }
  0x31   : > { %p492_p13 = por %p491_p12, %p490_p11 }
  0x33   : > { %p493_p0 = pnand %p492_p13, %p486_p10 }
  0x9c   : > { %v199_v6 = vpop.permute.xlu0 %198 }
  0x9d   : > { %202 = vst.msk [vmem:[#allocation2 + $0x8] sm:$0xf] %vm201_vm5, %v199_v6 }
  0xa0   : > { %v186_v7 = vpop.permute.xlu0 %185 }
  0xa1   : > { %189 = vst.msk [vmem:[#allocation2] sm:$0xf] %vm188_vm6, %v186_v7 }
  0xa2   : > { %v210_v11 = vpop.permute.xlu1 %209 }
  0xa4   : > { %v205_v8 = vld [vmem:[#allocation2 + $0x8] sm:$0xf] }
  0xa5   : > { %394 = vmatpush3.msk.msra.mxu0 %vm216_vm7, %v205_v8 }
  0xa6   : > { %395 = vmatprep.subr.mxu0 %v550_v0 }
  0xa8   : > { %v204_v10 = vld [vmem:[#allocation2] sm:$0xff] }
  0xa9   : > { %396 = vmatpush3.msra.mxu0 %v204_v10 }
  0xaa   : > { %398 = vmatmul.mubr.msk.f32.vlgmr.msra.gmra.mxu0 %vm212_vm8, %v203_v9 }
 0x16a   : > { %v286_v12 = vpop.f32.mrf.mxu0 }
 0x16b   : > { %v287_v13 = vadd.f32 %v286_v12, %v210_v11 }
 0x16c   : > { %v399_v14 = vpop.f32.mrf.mxu0 }
 0x16d   : > { %290 = vst [vmem:[%s174_s24] sm:$0xff] %v287_v13 }
 0x16e   : > { %496 = shalt.err (!%p493_p0)
}
 0x16f   : > { %s497_s6 = scalar_lea.hbm %s655_s28, 128  ;;  %s501_s9 = scalar_lea.hbm %s693_s3, 256 }
 0x170   : > { %p498_p1 = scmp.ne.s32.totalorder %s655_s28, %s497_s6  ;;  %p502_p4 = scmp.lt.s32.totalorder %s655_s28, %s693_s3 }
 0x171   : > { %p503_p7 = scmp.lt.s32.totalorder %s501_s9, %s497_s6 }
 0x172   : > { %p499_p2 = pnand %p498_p1, %p614_p5 }
 0x173   : > { %p504_p8 = por %p503_p7, %p502_p4 }
 0x174   : > { %p500_p3 = pneg %p499_p2 }
 0x176   : > { %p505_p6 = pnand %p504_p8, %p500_p3 }
 0x178   : > { %508 = shalt.err (!%p505_p6)
}
 0x179   : > { %404 = dma.vmem_to_hbm [thread:$0]  (%p614_p5), %s306_s25, 128, %s655_s28, %s292_s29  }
 0x17a PF: > { %p416_p9 = scmp.ge.s32.totalorder %s547_s15, 2  ;;  %s317_s17 = sand.u32 1, %s535_s12  }
 0x17b   : > { %p697_p10 = scmp.ne.s32.totalorder %s695_s23, 0  ;;  %s318_s19 = scalar_lea.sflag [#allocation5], %s317_s17 }
 0x17d   : > { %p411_p11 = pnand %p416_p9, %p697_p10 }
 0x17f   : > { %p412_p12 = pneg %p411_p11 }
 0x181   : > { %530 = dma.done.wait (%p412_p12), %s318_s19, 128  }
 0x182   : > { %532 = vsyncadd (%p412_p12), %s318_s19, 4294967168  ;;  %p14_p13 = scmp.ge.s32.totalorder %s601_s18, 4   ;;  %s698_s12 = smov %s539_s13 }
 0x183   : > { %s699_s13 = smov %s543_s14  ;;  %s700_s14 = smov %s612_s21 }
 0x184   : > { %s701_s15 = smov %s601_s18  ;;  %16 = sbr.rel (!%p14_p13) target bundleno = 4 (0x4), region = 72 }
 0x189   :  { %323 = vsyncpa [#allocation4], 1 }
 0x18a   :  { %325 = vsyncpa [#allocation4 + $0x1], 1 }
 0x18b   :  { %326 = vsyncpa [#allocation5], 1 }
 0x18c   :  { %328 = vsyncpa [#allocation5 + $0x1], 1 }

</bundles_post_ra>
